<compile_context>
chip_gen: v6e
topology: v6e:2x2x1
jax: 0.10.0
libtpu: 0.0.40
codegen_flags: <defaults>
</compile_context>

<pallas_src>
import math

import jax
import jax.numpy as jnp
from jax.experimental import pallas as pl
from jax.experimental.pallas import tpu as pltpu


def _round_up(x, m):
    return ((x + m - 1) // m) * m


def _broadcast_kernel(emb_ref, out_ref):
    # emb_ref : (1, D, 1)        this batch's time embedding (lane-splat source)
    # out_ref : (1, D, tile_hw)  current (batch, hw-tile) output block
    out_ref[...] = jnp.broadcast_to(emb_ref[...], out_ref.shape)


def temporal_encoding(x, timestamps, weight, bias):
    """Forward pass of TemporalEncoding.

    x          : [B, C, H, W]  (only its shape is used, like the PyTorch module)
    timestamps : [B]           hours since epoch
    weight     : [D, 4]        nn.Linear(4, D).weight (torch layout)
    bias       : [D]           nn.Linear(4, D).bias
    returns    : [B, D, H, W]  float32
    """
    B, C, H, W = x.shape
    D = weight.shape[0]
    HW = H * W

    # --- glue: time features + tiny linear projection (negligible in XLA) ---
    ts = timestamps.astype(jnp.float32)
    hours_in_day = 24.0
    hours_in_year = 24.0 * 365.0
    hour_of_day = jnp.mod(ts, hours_in_day) / hours_in_day
    day_of_year = jnp.mod(ts, hours_in_year) / hours_in_day / 365.0
    two_pi = 2.0 * math.pi
    time_features = jnp.stack(
        [jnp.sin(two_pi * hour_of_day), jnp.cos(two_pi * hour_of_day),
         jnp.sin(two_pi * day_of_year), jnp.cos(two_pi * day_of_year)],
        axis=1).astype(jnp.float32)                                  # (B, 4)
    emb = (time_features @ weight.T.astype(jnp.float32)
           + bias.astype(jnp.float32)).astype(jnp.float32)           # (B, D)
    emb = emb.reshape(B, D, 1)                                        # (B, D, 1)

    # --- tile sizing -------------------------------------------------------
    # Lane-dense (multiple of 128), capped at 2048 lanes (write roofline is
    # flat beyond ~1K lanes), kept under an 8 MiB double-buffer budget, and
    # split into >= ~4 HW tiles when possible so v7x's two TensorCores both
    # get store work via the "parallel" grid axes.
    VMEM_OUT_BUDGET = 8 << 20                       # bytes for 2x output bufs
    max_tile_vmem = max((VMEM_OUT_BUDGET // (2 * D * 4)) // 128 * 128, 128)
    tile_hw = min(2048, max_tile_vmem, _round_up(HW, 128))
    split_tile = max(128, _round_up(pl.cdiv(HW, 4), 128))
    tile_hw = max(128, min(tile_hw, split_tile))
    n_hw_tiles = pl.cdiv(HW, tile_hw)

    out_flat = pl.pallas_call(
        _broadcast_kernel,
        out_shape=jax.ShapeDtypeStruct((B, D, HW), jnp.float32),
        grid_spec=pltpu.PrefetchScalarGridSpec(
            num_scalar_prefetch=0,
            grid=(B, n_hw_tiles),
            in_specs=[
                pl.BlockSpec((1, D, 1), lambda b, t: (b, 0, 0)),      # emb
            ],
            out_specs=pl.BlockSpec((1, D, tile_hw), lambda b, t: (b, 0, t)),
        ),
        compiler_params=pltpu.CompilerParams(
            dimension_semantics=("parallel", "parallel")),
        cost_estimate=pl.CostEstimate(
            flops=0,
            transcendentals=0,
            bytes_accessed=B * D * HW * 4 + B * D * 4),
    )(emb)

    # Free reshape: HW is the flattened row-major last dim.
    return out_flat.reshape(B, D, H, W)


def _reference(x, timestamps, weight, bias):
    """Pure-JAX reference matching the PyTorch forward."""
    B, C, H, W = x.shape
    D = weight.shape[0]
    ts = timestamps.astype(jnp.float32)
    hour_of_day = jnp.mod(ts, 24.0) / 24.0
    day_of_year = jnp.mod(ts, 24.0 * 365.0) / 24.0 / 365.0
    two_pi = 2.0 * math.pi
    tf = jnp.stack(
        [jnp.sin(two_pi * hour_of_day), jnp.cos(two_pi * hour_of_day),
         jnp.sin(two_pi * day_of_year), jnp.cos(two_pi * day_of_year)],
        axis=1).astype(jnp.float32)
    emb = tf @ weight.T + bias                                        # (B, D)
    return jnp.broadcast_to(emb.reshape(B, D, 1, 1), (B, D, H, W))


if __name__ == "__main__":
    B, C, H, W = 2, 4, 16, 16
    d_model = 64

    key = jax.random.PRNGKey(0)
    kx, kw, kb, kt = jax.random.split(key, 4)

    x = jax.random.normal(kx, (B, C, H, W), dtype=jnp.float32)
    # "hours since epoch": realistic-ish positive magnitudes
    timestamps = (jax.random.uniform(kt, (B,), dtype=jnp.float32) * 1.0e5 + 4.5e5)

    # nn.Linear(4, d_model): weight [d_model, 4], bias [d_model]
    bound = 1.0 / math.sqrt(4.0)
    weight = jax.random.uniform(kw, (d_model, 4), minval=-bound, maxval=bound,
                                dtype=jnp.float32)
    bias = jax.random.uniform(kb, (d_model,), minval=-bound, maxval=bound,
                              dtype=jnp.float32)

    out = temporal_encoding(x, timestamps, weight, bias)
    out = jax.block_until_ready(out)

    ref = _reference(x, timestamps, weight, bias)
    assert out.shape == (B, d_model, H, W), out.shape
    assert out.dtype == jnp.float32
    assert jnp.allclose(out, ref, atol=1e-5, rtol=1e-5), "mismatch vs reference"

    print("KERNEL_OK")
</pallas_src>

<mosaic_0001>
module attributes {stable_mosaic.version = 11 : i64} {
  func.func @_broadcast_kernel(%arg0: i32, %arg1: i32, %arg2: memref<1x64x1xf32, #tpu.memory_space<vmem>>, %arg3: memref<1x64x128xf32, #tpu.memory_space<vmem>>) attributes {dimension_semantics = [#tpu.dimension_semantics<parallel>, #tpu.dimension_semantics<parallel>], iteration_bounds = array<i64: 2, 2>, scalar_prefetch = 0 : i64, scratch_operands = 0 : i64, tpu.core_type = #tpu.core_type<tc>, window_params = [{transform_indices = @transform_0, window_bounds = array<i64: 1, 64, 1>}, {transform_indices = @transform_1, window_bounds = array<i64: 1, 64, 128>}]} {
    %c0 = arith.constant 0 : index
    %c0_0 = arith.constant 0 : index
    %c0_1 = arith.constant 0 : index
    %0 = vector.load %arg2[%c0, %c0_0, %c0_1] : memref<1x64x1xf32, #tpu.memory_space<vmem>>, vector<1x64x1xf32>
    %1 = vector.shape_cast %0 : vector<1x64x1xf32> to vector<1x64x1xf32>
    %2 = vector.broadcast %1 : vector<1x64x1xf32> to vector<1x64x128xf32>
    %c0_2 = arith.constant 0 : index
    %c0_3 = arith.constant 0 : index
    %c0_4 = arith.constant 0 : index
    %3 = vector.load %arg3[%c0_2, %c0_3, %c0_4] : memref<1x64x128xf32, #tpu.memory_space<vmem>>, vector<1x64x128xf32>
    tpu.vector_store %arg3[%c0_2, %c0_3, %c0_4], %2 {strides = array<i32>} : memref<1x64x128xf32, #tpu.memory_space<vmem>>, vector<1x64x128xf32>,
    return
  }
  func.func @transform_0(%arg0: i32, %arg1: i32) -> (i32, i32, i32) {
    %c0_i32 = arith.constant 0 : i32
    %c0_i32_0 = arith.constant 0 : i32
    %c0_i32_1 = arith.constant 0 : i32
    return %arg0, %c0_i32, %c0_i32_0 : i32, i32, i32
  }
  func.func @transform_1(%arg0: i32, %arg1: i32) -> (i32, i32, i32) {
    %c0_i32 = arith.constant 0 : i32
    %c0_i32_0 = arith.constant 0 : i32
    return %arg0, %c0_i32, %arg1 : i32, i32, i32
  }
}

</mosaic_0001>

<bundles_post_ra>
// kernel: tpu_custom_call.1
= control target key start
LH: loop header
LB: loop body
LE: loop exit
PB: predicated region body
PF: predicated region fallthrough
CT: control target
= control target key end

     0   :  { %6 = vsyncpa [#allocation3], 0  ;;  %s612_s0 = inlined_call_operand.vmem [shape: f32[2,64,1], index: 0, kind: input, shape index: {}]   ;;  %s613_s1 = inlined_call_operand.hbm [shape: f32[2,64,256], index: 1, kind: output, shape index: {}]  }
   0x1   :  { %8 = vsyncpa [#allocation3 + $0x1], 0  ;;  %s475_s6 = smov 0   ;;  %s477_s7 = smov 0  }
   0x2   :  { %s479_s8 = smov 0   ;;  %s481_s9 = smov 0  }
   0x3   :  { %s483_s10 = smov 0   ;;  %s485_s11 = smov 0  }
   0x4   :  { %s487_s12 = smov 0   ;;  %s489_s13 = smov 0  }
   0x5 LB: > { %s275_s14 = sadd.s32 4294967295, %s458_s13   ;;  %s276_s15 = sadd.s32 4294967294, %s458_s13   ;;  %s458_s13 = sphi %s489_s13, %s14_s13   ;;  %s454_s12 = sphi %s487_s12, %s622_s12   ;;  %s450_s11 = sphi %s485_s11, %s621_s11   ;;  %s446_s10 = sphi %s483_s10, %s620_s10   ;;  %s442_s9 = sphi %s481_s9, %s619_s9   ;;  %s438_s8 = sphi %s479_s8, %s618_s8   ;;  %s434_s7 = sphi %s477_s7, %s617_s7   ;;  %s430_s6 = sphi %s475_s6, %s616_s6  }
   0x6   : > { %s23_s16 = sadd.s32 1, %s450_s11  ;;  %s26_s17 = sadd.s32 1, %s454_s12 }
   0x7   : > { %p24_p0 = scmp.ge.s32.totalorder %s23_s16, 2  ;;  %p71_p1 = scmp.ne.s32.totalorder %s438_s8, %s434_s7 }
   0x8   : > { %p72_p2 = scmp.eq.s32.totalorder %s275_s14, 3  ;;  %p77_p5 = scmp.ne.s32.totalorder %s434_s7, %s430_s6 }
   0x9   : > { %s624_s16 = smov (%p24_p0, %s23_s16), 0  ;;  %s626_s17 = smov (!%p24_p0, %s26_s17), %s454_s12 }
   0xa   : > { %s57_s18 = ssub.s32 %s450_s11, %s624_s16  ;;  %p526_p3 = por %p72_p2, %p71_p1 }
   0xb   : > { %p28_p4 = scmp.ge.s32.totalorder %s626_s17, 2  ;;  %p78_p6 = scmp.eq.s32.totalorder %s276_s15, 3 }
   0xc   : > { %p279_p7 = scmp.ge.s32.totalorder %s458_s13, 1  ;;  %p104_p9 = scmp.lt.s32.totalorder %s458_s13, 5 }
   0xd   : > { %s628_s17 = smov (%p28_p4, %s626_s17), 0  ;;  %p535_p8 = por %p78_p6, %p77_p5 }
   0xe   : > { %s56_s21 = ssub.s32 %s454_s12, %s628_s17  ;;  %s61_s22 = sadd.s32 1, %s438_s8 }
   0xf   : > { %s58_s23 = sor.u32 %s57_s18, %s56_s21  ;;  %p105_p10 = pnand %p279_p7, %p104_p9 }
  0x10   : > { %p59_p11 = scmp.eq.s32.totalorder %s58_s23, 0  ;;  %p124_p12 = scmp.lt.s32.totalorder (!%p105_p10), %s446_s10, 1 }
  0x11   : > { %108 = sbr.rel (%p105_p10) target bundleno = 178 (0xb2), region = 24  ;;  %s121_s30 = sand.u32 (!%p105_p10), 1, %s434_s7  }
  0x12   : > { %s544_s24 = scalar_select %p59_p11, %s438_s8, %s61_s22  }
  0x13   : > { %s280_s2 = sshll.u32 (!%p105_p10), %s121_s30, 6  ;;  %s284_s4 = sshll.u32 (!%p105_p10), %s446_s10, 4 }
  0x14   : > { %s123_s3 = scalar_lea.vmem (!%p105_p10), [#allocation2], %s280_s2  ;;  %s197_s5 = sadd.s32 (!%p105_p10), %s442_s9, %s284_s4 }
  0x15   : > { %s200_s14 = sshll.u32 (!%p105_p10), %s123_s3, 4  ;;  %s285_s15 = sshll.u32 (!%p105_p10), %s197_s5, 7  ;;  %s554_s14 = int_to_ptr.vmem [resolvable:$true] %s200_s14 }
  0x16   : > { %v460_v0 = vmov 0   ;;  %s125_s25 = scalar_select %p124_p12, %s446_s10, 1 }
  0x17   : > { %365 = vset.pattern.permute.xlu1 %v460_v0  ;;  %364 = vset.pattern.permute.xlu0 %v460_v0  ;;  %s559_s10 = scalar_lea.hbm %s613_s1, %s285_s15  ;;  %s561_s9 = scalar_lea.sflag [#allocation3], %s121_s30 }
  0x18   : > { %s288_s26 = sshll.u32 %s125_s25, 6  ;;  %s366_s22 = scalar_lea.vmem %s554_s14, 1024 }
  0x19   : > { %s128_s29 = scalar_lea.vmem %s612_s0, %s288_s26  ;;  %p367_p13 = scmp.ne.s32.totalorder %s554_s14, %s366_s22 }
  0x1a   : > { %v131_v1 = vld [vmem:[%s128_s29 + $0x10] sm:$0xff]  ;;  %v129_v2 = vld [vmem:[%s128_s29] sm:$0xff]  ;;  %v132_v3 = vld [vmem:[%s128_s29 + $0x18] sm:$0xff]  ;;  %s461_s23 = smov [#allocation2]  }
  0x1b   : > { %149 = vperm.xlu1 %365, %v131_v1   ;;  %139 = vperm.xlu0 %364, %v129_v2   ;;  %v130_v4 = vld [vmem:[%s128_s29 + $0x8] sm:$0xff]  ;;  %v133_v6 = vld [vmem:[%s128_s29 + $0x20] sm:$0xff]  ;;  %v136_v7 = vld [vmem:[%s128_s29 + $0x38] sm:$0xff]  ;;  %p368_p0 = pnand %p367_p13, %p526_p3  ;;  %s370_s25 = sshll.u32 %s461_s23, 4  ;;  %s371_s25 = int_to_ptr.vmem [resolvable:$false] %s370_s25 }
  0x1c   : > { %v134_v5 = vld [vmem:[%s128_s29 + $0x28] sm:$0xff]  ;;  %v135_v8 = vld [vmem:[%s128_s29 + $0x30] sm:$0xff]  ;;  %s372_s26 = scalar_lea.vmem %s371_s25, 2048  ;;  %p373_p2 = scmp.lt.s32.totalorder %s554_s14, %s371_s25 }
  0x1d   : > { %p369_p1 = pneg %p368_p0  ;;  %p374_p4 = scmp.lt.s32.totalorder %s372_s26, %s366_s22 }
  0x1f   : > { %154 = vperm.xlu1 %365, %v132_v3   ;;  %144 = vperm.xlu0 %364, %v130_v4   ;;  %p375_p5 = por %p374_p4, %p373_p2 }
  0x21   : > { %p376_p6 = pnand %p375_p5, %p369_p1 }
  0x23   : > { %164 = vperm.xlu1 %365, %v134_v5   ;;  %159 = vperm.xlu0 %364, %v133_v6  }
  0x27   : > { %174 = vperm.xlu1 %365, %v136_v7   ;;  %169 = vperm.xlu0 %364, %v135_v8  }
  0x96   : > { %v150_v9 = vpop.permute.xlu1 %149  ;;  %v140_v10 = vpop.permute.xlu0 %139 }
  0x97   : > { %179 = vst [vmem:[%s123_s3 + $0x10] sm:$0xff] %v150_v9  ;;  %177 = vst [vmem:[%s123_s3] sm:$0xff] %v140_v10 }
  0x9a   : > { %v155_v11 = vpop.permute.xlu1 %154  ;;  %v145_v12 = vpop.permute.xlu0 %144 }
  0x9b   : > { %180 = vst [vmem:[%s123_s3 + $0x18] sm:$0xff] %v155_v11  ;;  %178 = vst [vmem:[%s123_s3 + $0x8] sm:$0xff] %v145_v12 }
  0x9e   : > { %v165_v13 = vpop.permute.xlu1 %164  ;;  %v160_v14 = vpop.permute.xlu0 %159 }
  0x9f   : > { %182 = vst [vmem:[%s123_s3 + $0x28] sm:$0xff] %v165_v13  ;;  %181 = vst [vmem:[%s123_s3 + $0x20] sm:$0xff] %v160_v14 }
  0xa2   : > { %v175_v15 = vpop.permute.xlu1 %174  ;;  %v170_v16 = vpop.permute.xlu0 %169 }
  0xa3   : > { %184 = vst [vmem:[%s123_s3 + $0x38] sm:$0xff] %v175_v15  ;;  %183 = vst [vmem:[%s123_s3 + $0x30] sm:$0xff] %v170_v16 }
  0xa4   : > { %379 = shalt.err (!%p376_p6)
}
  0xa5   : > { %s380_s27 = scalar_lea.hbm %s559_s10, 1024  ;;  %s384_s30 = scalar_lea.hbm %s613_s1, 4096 }
  0xa6   : > { %p381_p7 = scmp.ne.s32.totalorder %s559_s10, %s380_s27  ;;  %p385_p11 = scmp.lt.s32.totalorder %s559_s10, %s613_s1 }
  0xa7   : > { %p386_p12 = scmp.lt.s32.totalorder %s384_s30, %s380_s27 }
  0xa8   : > { %p382_p9 = pnand %p381_p7, %p526_p3 }
  0xa9   : > { %p387_p13 = por %p386_p12, %p385_p11 }
  0xaa   : > { %p383_p10 = pneg %p382_p9 }
  0xac   : > { %p388_p0 = pnand %p387_p13, %p383_p10 }
  0xae   : > { %391 = shalt.err (!%p388_p0)
}
  0xaf   : > { %s462_s4 = smov 128   ;;  %s463_s5 = smov 256  }
  0xb0   : > { %s464_s15 = smov 8  }
  0xb1   : > { %289 = dma.vmem_to_hbm [thread:$0]  (%p526_p3), %s554_s14, 1024, %s559_s10, %s561_s9, %s462_s4, %s463_s5, %s464_s15  }
  0xb2 PF: > { %p295_p1 = scmp.ge.s32.totalorder %s458_s13, 2  ;;  %s215_s18 = sand.u32 1, %s430_s6  }
  0xb3   : > { %s216_s21 = scalar_lea.sflag [#allocation3], %s215_s18 }
  0xb4   : > { %p292_p2 = pnand %p295_p1, %p535_p8 }
  0xb6   : > { %p293_p4 = pneg %p292_p2 }
  0xb8   : > { %425 = dma.done.wait (%p293_p4), %s216_s21, 1024  }
  0xb9   : > { %427 = vsyncadd (%p293_p4), %s216_s21, 4294966272  ;;  %s14_s13 = sadd.s32 1, %s458_s13   ;;  %s616_s6 = smov %s434_s7 }
  0xba   : > { %p11_p5 = scmp.ge.s32.totalorder %s14_s13, 6   ;;  %s617_s7 = smov %s438_s8 }
  0xbb   : > { %s618_s8 = smov %s544_s24  ;;  %s619_s9 = smov %s450_s11 }
  0xbc   : > { %s620_s10 = smov %s454_s12  ;;  %s621_s11 = smov %s624_s16 }
  0xbd   : > { %s622_s12 = smov %s628_s17  ;;  %13 = sbr.rel (!%p11_p5) target bundleno = 5 (0x5), region = 59 }
  0xc2   :  { %221 = vsyncpa [#allocation3], 1 }
  0xc3   :  { %223 = vsyncpa [#allocation3 + $0x1], 1 }

</bundles_post_ra>
